<compile_context>
chip_gen: v5e
topology: v5e:2x2
jax: 0.10.0
libtpu: 0.0.40
codegen_flags: <defaults>
</compile_context>

<pallas_src>
import functools

import jax
import jax.numpy as jnp
from jax.experimental import pallas as pl
from jax.experimental.pallas import tpu as pltpu

K_TOP = 3
N_ROWS = 5   # broadcast rows of x / linear.out_features
D_IN = 4     # linear.in_features


def _round_up(x, m):
    return (x + m - 1) // m * m


def _topk_kernel(w_ref, c_ref, x_ref, vals_ref, idx_ref):
    """One batch tile.

    w_ref   : SMEM (20,)   f32  -- linear.weight flattened row-major (W[k,d] at k*4+d)
    c_ref   : VMEM (5, 5)  f32  -- C = W @ W^T + b   (C[n, k])
    x_ref   : VMEM (4,5,T) f32  -- x transposed to (d, n, batch); batch on lanes
    vals_ref: VMEM (3, T)  f32  -- top-3 values (descending), batch on lanes
    idx_ref : VMEM (3, T)  i32  -- top-3 row indices
    """
    xd = [x_ref[d] for d in range(D_IN)]                      # 4 x (5, T)

    # s[n, :] = sum_k relu( sum_d W[k,d] * x[d,n,:] + C[n,k] )   -- unrolled VPU FMAs
    s = None
    for k in range(N_ROWS):
        acc = xd[0] * w_ref[k * D_IN + 0]
        for d in range(1, D_IN):
            acc = acc + xd[d] * w_ref[k * D_IN + d]
        zk = acc + c_ref[:, k:k + 1]                           # (5, T), lane-broadcast C[:, k]
        rk = jnp.maximum(zk, 0.0)
        s = rk if s is None else s + rk                        # (5, T)

    # Unrolled top-3 across the 5 rows (first-occurrence tie break, like lax.top_k).
    v = [s[n:n + 1, :] for n in range(N_ROWS)]                 # 5 x (1, T)
    out_v, out_i = [], []
    for p in range(K_TOP):
        m = v[0]
        for n in range(1, N_ROWS):
            m = jnp.maximum(m, v[n])                           # row-wise max, pure VPU
        idx = jnp.full(m.shape, N_ROWS - 1, dtype=jnp.int32)
        for n in range(N_ROWS - 2, -1, -1):                    # first occurrence wins
            idx = jnp.where(v[n] == m, jnp.int32(n), idx)
        out_v.append(m)
        out_i.append(idx)
        if p + 1 < K_TOP:
            # s >= 0 (sum of relus) so -inf masking is safe.
            v = [jnp.where(idx == n, -jnp.inf, v[n]) for n in range(N_ROWS)]

    vals_ref[...] = jnp.concatenate(out_v, axis=0)             # (3, T) lane-dense store
    idx_ref[...] = jnp.concatenate(out_i, axis=0)              # (3, T)


@functools.partial(jax.jit, static_argnames=("tile_b",))
def my_module_forward(x, w, b, tile_b=512):
    """x: (B, 5, 4) f32; w: (5, 4) f32; b: (5,) f32 -> (values (B,3) f32, indices (B,3) i32)."""
    B = x.shape[0]
    assert x.shape[1:] == (N_ROWS, D_IN) and w.shape == (N_ROWS, D_IN)

    # Constant fold: (x + W) @ W^T + b == x @ W^T + (W @ W^T + b)
    c = (w @ w.T + b[None, :]).astype(jnp.float32)             # (5, 5)
    w_flat = w.reshape(-1).astype(jnp.float32)                 # (20,)

    # Batch on lanes: (B, 5, 4) -> (4, 5, B); pad B to a lane-aligned tile multiple.
    x_t = jnp.transpose(x, (2, 1, 0)).astype(jnp.float32)      # (4, 5, B)
    tb = min(tile_b, _round_up(B, 128))
    b_pad = _round_up(B, tb)
    if b_pad != B:
        x_t = jnp.pad(x_t, ((0, 0), (0, 0), (0, b_pad - B)))
    grid = (b_pad // tb,)

    vals_t, idx_t = pl.pallas_call(
        _topk_kernel,
        out_shape=(
            jax.ShapeDtypeStruct((K_TOP, b_pad), jnp.float32),
            jax.ShapeDtypeStruct((K_TOP, b_pad), jnp.int32),
        ),
        grid=grid,
        in_specs=[
            pl.BlockSpec(memory_space=pltpu.MemorySpace.SMEM),         # W scalars, resident
            pl.BlockSpec((N_ROWS, N_ROWS), lambda i: (0, 0)),          # C, resident in VMEM
            pl.BlockSpec((D_IN, N_ROWS, tb), lambda i: (0, 0, i)),     # x batch tile
        ],
        out_specs=(
            pl.BlockSpec((K_TOP, tb), lambda i: (0, i)),
            pl.BlockSpec((K_TOP, tb), lambda i: (0, i)),
        ),
        compiler_params=pltpu.CompilerParams(
            dimension_semantics=("parallel",)),
    )(w_flat, c, x_t)

    # Back to torch layout (B, 3); drop batch padding.
    vals = vals_t[:, :B].T
    idxs = idx_t[:, :B].T
    return vals, idxs


def _reference(x, w, b):
    y = x + w[None, :, :]
    z = jnp.einsum("bnd,kd->bnk", y, w) + b[None, None, :]
    s = jnp.sum(jnp.maximum(z, 0.0), axis=-1)
    vals, idxs = jax.lax.top_k(s, K_TOP)
    return vals, idxs.astype(jnp.int32)


if __name__ == "__main__":
    key = jax.random.PRNGKey(0)
    k_x, k_w, k_b, k_p, k_x2 = jax.random.split(key, 5)

    # Parameters (shapes from __init__: Linear(4, 5) -> weight (5,4), bias (5,); param (3,4) unused)
    w = jax.random.uniform(k_w, (N_ROWS, D_IN), jnp.float32, minval=-0.5, maxval=0.5)
    b = jax.random.uniform(k_b, (N_ROWS,), jnp.float32, minval=-0.5, maxval=0.5)
    _param = jax.random.uniform(k_p, (3, 4), jnp.float32)  # unused in forward (as in PyTorch)

    for name, bs, kx in (("small", 2, k_x), ("multi-tile", 1200, k_x2)):
        x = jax.random.normal(kx, (bs, N_ROWS, D_IN), jnp.float32)
        vals, idxs = my_module_forward(x, w, b)
        jax.block_until_ready((vals, idxs))

        ref_vals, ref_idxs = _reference(x, w, b)
        assert jnp.allclose(vals, ref_vals, atol=1e-5, rtol=1e-5), (name, vals, ref_vals)
        assert jnp.array_equal(idxs, ref_idxs), (name, idxs, ref_idxs)

    print("KERNEL_OK")
</pallas_src>

<mosaic_0001>
module attributes {stable_mosaic.version = 11 : i64} {
  func.func @_topk_kernel(%arg0: i32, %arg1: memref<20xf32, #tpu.memory_space<smem>>, %arg2: memref<5x5xf32, #tpu.memory_space<vmem>>, %arg3: memref<4x5x128xf32, #tpu.memory_space<vmem>>, %arg4: memref<3x128xf32, #tpu.memory_space<vmem>>, %arg5: memref<3x128xi32, #tpu.memory_space<vmem>>) attributes {dimension_semantics = [#tpu.dimension_semantics<parallel>], iteration_bounds = array<i64: 1>, scalar_prefetch = 0 : i64, scratch_operands = 0 : i64, tpu.core_type = #tpu.core_type<tc>, window_params = [{transform_indices = @transform_0, window_bounds = array<i64: 20>}, {pipeline_mode = #tpu.pipeline_mode<synchronous>, transform_indices = @transform_1, window_bounds = array<i64: 5, 5>}, {transform_indices = @transform_2, window_bounds = array<i64: 4, 5, 128>}, {transform_indices = @transform_3, window_bounds = array<i64: 3, 128>}, {transform_indices = @transform_4, window_bounds = array<i64: 3, 128>}]} {
    %c0 = arith.constant 0 : index
    %c0_0 = arith.constant 0 : index
    %c0_1 = arith.constant 0 : index
    %0 = vector.load %arg3[%c0, %c0_0, %c0_1] : memref<4x5x128xf32, #tpu.memory_space<vmem>>, vector<1x5x128xf32>
    %1 = vector.shape_cast %0 : vector<1x5x128xf32> to vector<5x128xf32>
    %c1 = arith.constant 1 : index
    %c0_2 = arith.constant 0 : index
    %c0_3 = arith.constant 0 : index
    %2 = vector.load %arg3[%c1, %c0_2, %c0_3] : memref<4x5x128xf32, #tpu.memory_space<vmem>>, vector<1x5x128xf32>
    %3 = vector.shape_cast %2 : vector<1x5x128xf32> to vector<5x128xf32>
    %c2 = arith.constant 2 : index
    %c0_4 = arith.constant 0 : index
    %c0_5 = arith.constant 0 : index
    %4 = vector.load %arg3[%c2, %c0_4, %c0_5] : memref<4x5x128xf32, #tpu.memory_space<vmem>>, vector<1x5x128xf32>
    %5 = vector.shape_cast %4 : vector<1x5x128xf32> to vector<5x128xf32>
    %c3 = arith.constant 3 : index
    %c0_6 = arith.constant 0 : index
    %c0_7 = arith.constant 0 : index
    %6 = vector.load %arg3[%c3, %c0_6, %c0_7] : memref<4x5x128xf32, #tpu.memory_space<vmem>>, vector<1x5x128xf32>
    %7 = vector.shape_cast %6 : vector<1x5x128xf32> to vector<5x128xf32>
    %c0_8 = arith.constant 0 : index
    %8 = memref.load %arg1[%c0_8] : memref<20xf32, #tpu.memory_space<smem>>
    %9 = vector.broadcast %8 : f32 to vector<5x128xf32>
    %10 = arith.mulf %1, %9 : vector<5x128xf32>
    %c1_9 = arith.constant 1 : index
    %11 = memref.load %arg1[%c1_9] : memref<20xf32, #tpu.memory_space<smem>>
    %12 = vector.broadcast %11 : f32 to vector<5x128xf32>
    %13 = arith.mulf %3, %12 : vector<5x128xf32>
    %14 = arith.addf %10, %13 : vector<5x128xf32>
    %c2_10 = arith.constant 2 : index
    %15 = memref.load %arg1[%c2_10] : memref<20xf32, #tpu.memory_space<smem>>
    %16 = vector.broadcast %15 : f32 to vector<5x128xf32>
    %17 = arith.mulf %5, %16 : vector<5x128xf32>
    %18 = arith.addf %14, %17 : vector<5x128xf32>
    %c3_11 = arith.constant 3 : index
    %19 = memref.load %arg1[%c3_11] : memref<20xf32, #tpu.memory_space<smem>>
    %20 = vector.broadcast %19 : f32 to vector<5x128xf32>
    %21 = arith.mulf %7, %20 : vector<5x128xf32>
    %22 = arith.addf %18, %21 : vector<5x128xf32>
    %c0_12 = arith.constant 0 : index
    %c0_13 = arith.constant 0 : index
    %23 = vector.load %arg2[%c0_12, %c0_13] : memref<5x5xf32, #tpu.memory_space<vmem>>, vector<5x1xf32>
    %24 = vector.broadcast %23 : vector<5x1xf32> to vector<5x128xf32>
    %25 = arith.addf %22, %24 : vector<5x128xf32>
    %cst = arith.constant 0.000000e+00 : f32
    %26 = vector.broadcast %cst : f32 to vector<5x128xf32>
    %27 = arith.maximumf %25, %26 : vector<5x128xf32>
    %c4 = arith.constant 4 : index
    %28 = memref.load %arg1[%c4] : memref<20xf32, #tpu.memory_space<smem>>
    %29 = vector.broadcast %28 : f32 to vector<5x128xf32>
    %30 = arith.mulf %1, %29 : vector<5x128xf32>
    %c5 = arith.constant 5 : index
    %31 = memref.load %arg1[%c5] : memref<20xf32, #tpu.memory_space<smem>>
    %32 = vector.broadcast %31 : f32 to vector<5x128xf32>
    %33 = arith.mulf %3, %32 : vector<5x128xf32>
    %34 = arith.addf %30, %33 : vector<5x128xf32>
    %c6 = arith.constant 6 : index
    %35 = memref.load %arg1[%c6] : memref<20xf32, #tpu.memory_space<smem>>
    %36 = vector.broadcast %35 : f32 to vector<5x128xf32>
    %37 = arith.mulf %5, %36 : vector<5x128xf32>
    %38 = arith.addf %34, %37 : vector<5x128xf32>
    %c7 = arith.constant 7 : index
    %39 = memref.load %arg1[%c7] : memref<20xf32, #tpu.memory_space<smem>>
    %40 = vector.broadcast %39 : f32 to vector<5x128xf32>
    %41 = arith.mulf %7, %40 : vector<5x128xf32>
    %42 = arith.addf %38, %41 : vector<5x128xf32>
    %c0_14 = arith.constant 0 : index
    %c1_15 = arith.constant 1 : index
    %43 = vector.load %arg2[%c0_14, %c1_15] : memref<5x5xf32, #tpu.memory_space<vmem>>, vector<5x1xf32>
    %44 = vector.broadcast %43 : vector<5x1xf32> to vector<5x128xf32>
    %45 = arith.addf %42, %44 : vector<5x128xf32>
    %cst_16 = arith.constant 0.000000e+00 : f32
    %46 = vector.broadcast %cst_16 : f32 to vector<5x128xf32>
    %47 = arith.maximumf %45, %46 : vector<5x128xf32>
    %48 = arith.addf %27, %47 : vector<5x128xf32>
    %c8 = arith.constant 8 : index
    %49 = memref.load %arg1[%c8] : memref<20xf32, #tpu.memory_space<smem>>
    %50 = vector.broadcast %49 : f32 to vector<5x128xf32>
    %51 = arith.mulf %1, %50 : vector<5x128xf32>
    %c9 = arith.constant 9 : index
    %52 = memref.load %arg1[%c9] : memref<20xf32, #tpu.memory_space<smem>>
    %53 = vector.broadcast %52 : f32 to vector<5x128xf32>
    %54 = arith.mulf %3, %53 : vector<5x128xf32>
    %55 = arith.addf %51, %54 : vector<5x128xf32>
    %c10 = arith.constant 10 : index
    %56 = memref.load %arg1[%c10] : memref<20xf32, #tpu.memory_space<smem>>
    %57 = vector.broadcast %56 : f32 to vector<5x128xf32>
    %58 = arith.mulf %5, %57 : vector<5x128xf32>
    %59 = arith.addf %55, %58 : vector<5x128xf32>
    %c11 = arith.constant 11 : index
    %60 = memref.load %arg1[%c11] : memref<20xf32, #tpu.memory_space<smem>>
    %61 = vector.broadcast %60 : f32 to vector<5x128xf32>
    %62 = arith.mulf %7, %61 : vector<5x128xf32>
    %63 = arith.addf %59, %62 : vector<5x128xf32>
    %c0_17 = arith.constant 0 : index
    %c2_18 = arith.constant 2 : index
    %64 = vector.load %arg2[%c0_17, %c2_18] : memref<5x5xf32, #tpu.memory_space<vmem>>, vector<5x1xf32>
    %65 = vector.broadcast %64 : vector<5x1xf32> to vector<5x128xf32>
    %66 = arith.addf %63, %65 : vector<5x128xf32>
    %cst_19 = arith.constant 0.000000e+00 : f32
    %67 = vector.broadcast %cst_19 : f32 to vector<5x128xf32>
    %68 = arith.maximumf %66, %67 : vector<5x128xf32>
    %69 = arith.addf %48, %68 : vector<5x128xf32>
    %c12 = arith.constant 12 : index
    %70 = memref.load %arg1[%c12] : memref<20xf32, #tpu.memory_space<smem>>
    %71 = vector.broadcast %70 : f32 to vector<5x128xf32>
    %72 = arith.mulf %1, %71 : vector<5x128xf32>
    %c13 = arith.constant 13 : index
    %73 = memref.load %arg1[%c13] : memref<20xf32, #tpu.memory_space<smem>>
    %74 = vector.broadcast %73 : f32 to vector<5x128xf32>
    %75 = arith.mulf %3, %74 : vector<5x128xf32>
    %76 = arith.addf %72, %75 : vector<5x128xf32>
    %c14 = arith.constant 14 : index
    %77 = memref.load %arg1[%c14] : memref<20xf32, #tpu.memory_space<smem>>
    %78 = vector.broadcast %77 : f32 to vector<5x128xf32>
    %79 = arith.mulf %5, %78 : vector<5x128xf32>
    %80 = arith.addf %76, %79 : vector<5x128xf32>
    %c15 = arith.constant 15 : index
    %81 = memref.load %arg1[%c15] : memref<20xf32, #tpu.memory_space<smem>>
    %82 = vector.broadcast %81 : f32 to vector<5x128xf32>
    %83 = arith.mulf %7, %82 : vector<5x128xf32>
    %84 = arith.addf %80, %83 : vector<5x128xf32>
    %c0_20 = arith.constant 0 : index
    %c3_21 = arith.constant 3 : index
    %85 = vector.load %arg2[%c0_20, %c3_21] : memref<5x5xf32, #tpu.memory_space<vmem>>, vector<5x1xf32>
    %86 = vector.broadcast %85 : vector<5x1xf32> to vector<5x128xf32>
    %87 = arith.addf %84, %86 : vector<5x128xf32>
    %cst_22 = arith.constant 0.000000e+00 : f32
    %88 = vector.broadcast %cst_22 : f32 to vector<5x128xf32>
    %89 = arith.maximumf %87, %88 : vector<5x128xf32>
    %90 = arith.addf %69, %89 : vector<5x128xf32>
    %c16 = arith.constant 16 : index
    %91 = memref.load %arg1[%c16] : memref<20xf32, #tpu.memory_space<smem>>
    %92 = vector.broadcast %91 : f32 to vector<5x128xf32>
    %93 = arith.mulf %1, %92 : vector<5x128xf32>
    %c17 = arith.constant 17 : index
    %94 = memref.load %arg1[%c17] : memref<20xf32, #tpu.memory_space<smem>>
    %95 = vector.broadcast %94 : f32 to vector<5x128xf32>
    %96 = arith.mulf %3, %95 : vector<5x128xf32>
    %97 = arith.addf %93, %96 : vector<5x128xf32>
    %c18 = arith.constant 18 : index
    %98 = memref.load %arg1[%c18] : memref<20xf32, #tpu.memory_space<smem>>
    %99 = vector.broadcast %98 : f32 to vector<5x128xf32>
    %100 = arith.mulf %5, %99 : vector<5x128xf32>
    %101 = arith.addf %97, %100 : vector<5x128xf32>
    %c19 = arith.constant 19 : index
    %102 = memref.load %arg1[%c19] : memref<20xf32, #tpu.memory_space<smem>>
    %103 = vector.broadcast %102 : f32 to vector<5x128xf32>
    %104 = arith.mulf %7, %103 : vector<5x128xf32>
    %105 = arith.addf %101, %104 : vector<5x128xf32>
    %c0_23 = arith.constant 0 : index
    %c4_24 = arith.constant 4 : index
    %106 = vector.load %arg2[%c0_23, %c4_24] : memref<5x5xf32, #tpu.memory_space<vmem>>, vector<5x1xf32>
    %107 = vector.broadcast %106 : vector<5x1xf32> to vector<5x128xf32>
    %108 = arith.addf %105, %107 : vector<5x128xf32>
    %cst_25 = arith.constant 0.000000e+00 : f32
    %109 = vector.broadcast %cst_25 : f32 to vector<5x128xf32>
    %110 = arith.maximumf %108, %109 : vector<5x128xf32>
    %111 = arith.addf %90, %110 : vector<5x128xf32>
    %112 = vector.extract_strided_slice %111 {offsets = [0, 0], sizes = [1, 128], strides = [1, 1]} : vector<5x128xf32> to vector<1x128xf32>
    %113 = vector.extract_strided_slice %111 {offsets = [1, 0], sizes = [1, 128], strides = [1, 1]} : vector<5x128xf32> to vector<1x128xf32>
    %114 = vector.extract_strided_slice %111 {offsets = [2, 0], sizes = [1, 128], strides = [1, 1]} : vector<5x128xf32> to vector<1x128xf32>
    %115 = vector.extract_strided_slice %111 {offsets = [3, 0], sizes = [1, 128], strides = [1, 1]} : vector<5x128xf32> to vector<1x128xf32>
    %116 = vector.extract_strided_slice %111 {offsets = [4, 0], sizes = [1, 128], strides = [1, 1]} : vector<5x128xf32> to vector<1x128xf32>
    %117 = arith.maximumf %112, %113 : vector<1x128xf32>
    %118 = arith.maximumf %117, %114 : vector<1x128xf32>
    %119 = arith.maximumf %118, %115 : vector<1x128xf32>
    %120 = arith.maximumf %119, %116 : vector<1x128xf32>
    %c4_i32 = arith.constant 4 : i32
    %121 = vector.broadcast %c4_i32 : i32 to vector<1x128xi32>
    %122 = arith.cmpf oeq, %115, %120 : vector<1x128xf32>
    %c3_i32 = arith.constant 3 : i32
    %123 = vector.broadcast %c3_i32 : i32 to vector<1x128xi32>
    %124 = arith.select %122, %123, %121 : vector<1x128xi1>, vector<1x128xi32>
    %125 = arith.cmpf oeq, %114, %120 : vector<1x128xf32>
    %c2_i32 = arith.constant 2 : i32
    %126 = vector.broadcast %c2_i32 : i32 to vector<1x128xi32>
    %127 = arith.select %125, %126, %124 : vector<1x128xi1>, vector<1x128xi32>
    %128 = arith.cmpf oeq, %113, %120 : vector<1x128xf32>
    %c1_i32 = arith.constant 1 : i32
    %129 = vector.broadcast %c1_i32 : i32 to vector<1x128xi32>
    %130 = arith.select %128, %129, %127 : vector<1x128xi1>, vector<1x128xi32>
    %131 = arith.cmpf oeq, %112, %120 : vector<1x128xf32>
    %c0_i32 = arith.constant 0 : i32
    %132 = vector.broadcast %c0_i32 : i32 to vector<1x128xi32>
    %133 = arith.select %131, %132, %130 : vector<1x128xi1>, vector<1x128xi32>
    %c0_i32_26 = arith.constant 0 : i32
    %134 = vector.broadcast %c0_i32_26 : i32 to vector<1x128xi32>
    %135 = arith.cmpi eq, %133, %134 : vector<1x128xi32>
    %cst_27 = arith.constant 0xFF800000 : f32
    %136 = vector.broadcast %cst_27 : f32 to vector<1x128xf32>
    %137 = arith.select %135, %136, %112 : vector<1x128xi1>, vector<1x128xf32>
    %c1_i32_28 = arith.constant 1 : i32
    %138 = vector.broadcast %c1_i32_28 : i32 to vector<1x128xi32>
    %139 = arith.cmpi eq, %133, %138 : vector<1x128xi32>
    %cst_29 = arith.constant 0xFF800000 : f32
    %140 = vector.broadcast %cst_29 : f32 to vector<1x128xf32>
    %141 = arith.select %139, %140, %113 : vector<1x128xi1>, vector<1x128xf32>
    %c2_i32_30 = arith.constant 2 : i32
    %142 = vector.broadcast %c2_i32_30 : i32 to vector<1x128xi32>
    %143 = arith.cmpi eq, %133, %142 : vector<1x128xi32>
    %cst_31 = arith.constant 0xFF800000 : f32
    %144 = vector.broadcast %cst_31 : f32 to vector<1x128xf32>
    %145 = arith.select %143, %144, %114 : vector<1x128xi1>, vector<1x128xf32>
    %c3_i32_32 = arith.constant 3 : i32
    %146 = vector.broadcast %c3_i32_32 : i32 to vector<1x128xi32>
    %147 = arith.cmpi eq, %133, %146 : vector<1x128xi32>
    %cst_33 = arith.constant 0xFF800000 : f32
    %148 = vector.broadcast %cst_33 : f32 to vector<1x128xf32>
    %149 = arith.select %147, %148, %115 : vector<1x128xi1>, vector<1x128xf32>
    %c4_i32_34 = arith.constant 4 : i32
    %150 = vector.broadcast %c4_i32_34 : i32 to vector<1x128xi32>
    %151 = arith.cmpi eq, %133, %150 : vector<1x128xi32>
    %cst_35 = arith.constant 0xFF800000 : f32
    %152 = vector.broadcast %cst_35 : f32 to vector<1x128xf32>
    %153 = arith.select %151, %152, %116 : vector<1x128xi1>, vector<1x128xf32>
    %154 = arith.maximumf %137, %141 : vector<1x128xf32>
    %155 = arith.maximumf %154, %145 : vector<1x128xf32>
    %156 = arith.maximumf %155, %149 : vector<1x128xf32>
    %157 = arith.maximumf %156, %153 : vector<1x128xf32>
    %c4_i32_36 = arith.constant 4 : i32
    %158 = vector.broadcast %c4_i32_36 : i32 to vector<1x128xi32>
    %159 = arith.cmpf oeq, %149, %157 : vector<1x128xf32>
    %c3_i32_37 = arith.constant 3 : i32
    %160 = vector.broadcast %c3_i32_37 : i32 to vector<1x128xi32>
    %161 = arith.select %159, %160, %158 : vector<1x128xi1>, vector<1x128xi32>
    %162 = arith.cmpf oeq, %145, %157 : vector<1x128xf32>
    %c2_i32_38 = arith.constant 2 : i32
    %163 = vector.broadcast %c2_i32_38 : i32 to vector<1x128xi32>
    %164 = arith.select %162, %163, %161 : vector<1x128xi1>, vector<1x128xi32>
    %165 = arith.cmpf oeq, %141, %157 : vector<1x128xf32>
    %c1_i32_39 = arith.constant 1 : i32
    %166 = vector.broadcast %c1_i32_39 : i32 to vector<1x128xi32>
    %167 = arith.select %165, %166, %164 : vector<1x128xi1>, vector<1x128xi32>
    %168 = arith.cmpf oeq, %137, %157 : vector<1x128xf32>
    %c0_i32_40 = arith.constant 0 : i32
    %169 = vector.broadcast %c0_i32_40 : i32 to vector<1x128xi32>
    %170 = arith.select %168, %169, %167 : vector<1x128xi1>, vector<1x128xi32>
    %c0_i32_41 = arith.constant 0 : i32
    %171 = vector.broadcast %c0_i32_41 : i32 to vector<1x128xi32>
    %172 = arith.cmpi eq, %170, %171 : vector<1x128xi32>
    %cst_42 = arith.constant 0xFF800000 : f32
    %173 = vector.broadcast %cst_42 : f32 to vector<1x128xf32>
    %174 = arith.select %172, %173, %137 : vector<1x128xi1>, vector<1x128xf32>
    %c1_i32_43 = arith.constant 1 : i32
    %175 = vector.broadcast %c1_i32_43 : i32 to vector<1x128xi32>
    %176 = arith.cmpi eq, %170, %175 : vector<1x128xi32>
    %cst_44 = arith.constant 0xFF800000 : f32
    %177 = vector.broadcast %cst_44 : f32 to vector<1x128xf32>
    %178 = arith.select %176, %177, %141 : vector<1x128xi1>, vector<1x128xf32>
    %c2_i32_45 = arith.constant 2 : i32
    %179 = vector.broadcast %c2_i32_45 : i32 to vector<1x128xi32>
    %180 = arith.cmpi eq, %170, %179 : vector<1x128xi32>
    %cst_46 = arith.constant 0xFF800000 : f32
    %181 = vector.broadcast %cst_46 : f32 to vector<1x128xf32>
    %182 = arith.select %180, %181, %145 : vector<1x128xi1>, vector<1x128xf32>
    %c3_i32_47 = arith.constant 3 : i32
    %183 = vector.broadcast %c3_i32_47 : i32 to vector<1x128xi32>
    %184 = arith.cmpi eq, %170, %183 : vector<1x128xi32>
    %cst_48 = arith.constant 0xFF800000 : f32
    %185 = vector.broadcast %cst_48 : f32 to vector<1x128xf32>
    %186 = arith.select %184, %185, %149 : vector<1x128xi1>, vector<1x128xf32>
    %c4_i32_49 = arith.constant 4 : i32
    %187 = vector.broadcast %c4_i32_49 : i32 to vector<1x128xi32>
    %188 = arith.cmpi eq, %170, %187 : vector<1x128xi32>
    %cst_50 = arith.constant 0xFF800000 : f32
    %189 = vector.broadcast %cst_50 : f32 to vector<1x128xf32>
    %190 = arith.select %188, %189, %153 : vector<1x128xi1>, vector<1x128xf32>
    %191 = arith.maximumf %174, %178 : vector<1x128xf32>
    %192 = arith.maximumf %191, %182 : vector<1x128xf32>
    %193 = arith.maximumf %192, %186 : vector<1x128xf32>
    %194 = arith.maximumf %193, %190 : vector<1x128xf32>
    %c4_i32_51 = arith.constant 4 : i32
    %195 = vector.broadcast %c4_i32_51 : i32 to vector<1x128xi32>
    %196 = arith.cmpf oeq, %186, %194 : vector<1x128xf32>
    %c3_i32_52 = arith.constant 3 : i32
    %197 = vector.broadcast %c3_i32_52 : i32 to vector<1x128xi32>
    %198 = arith.select %196, %197, %195 : vector<1x128xi1>, vector<1x128xi32>
    %199 = arith.cmpf oeq, %182, %194 : vector<1x128xf32>
    %c2_i32_53 = arith.constant 2 : i32
    %200 = vector.broadcast %c2_i32_53 : i32 to vector<1x128xi32>
    %201 = arith.select %199, %200, %198 : vector<1x128xi1>, vector<1x128xi32>
    %202 = arith.cmpf oeq, %178, %194 : vector<1x128xf32>
    %c1_i32_54 = arith.constant 1 : i32
    %203 = vector.broadcast %c1_i32_54 : i32 to vector<1x128xi32>
    %204 = arith.select %202, %203, %201 : vector<1x128xi1>, vector<1x128xi32>
    %205 = arith.cmpf oeq, %174, %194 : vector<1x128xf32>
    %c0_i32_55 = arith.constant 0 : i32
    %206 = vector.broadcast %c0_i32_55 : i32 to vector<1x128xi32>
    %207 = arith.select %205, %206, %204 : vector<1x128xi1>, vector<1x128xi32>
    %208 = tpu.concatenate %120, %157, %194 in 0 : vector<1x128xf32>, vector<1x128xf32>, vector<1x128xf32> -> vector<3x128xf32>
    %c0_56 = arith.constant 0 : index
    %c0_57 = arith.constant 0 : index
    %209 = vector.load %arg4[%c0_56, %c0_57] : memref<3x128xf32, #tpu.memory_space<vmem>>, vector<3x128xf32>
    tpu.vector_store %arg4[%c0_56, %c0_57], %208 {strides = array<i32>} : memref<3x128xf32, #tpu.memory_space<vmem>>, vector<3x128xf32>,
    %210 = tpu.concatenate %133, %170, %207 in 0 : vector<1x128xi32>, vector<1x128xi32>, vector<1x128xi32> -> vector<3x128xi32>
    %c0_58 = arith.constant 0 : index
    %c0_59 = arith.constant 0 : index
    %211 = vector.load %arg5[%c0_58, %c0_59] : memref<3x128xi32, #tpu.memory_space<vmem>>, vector<3x128xi32>
    tpu.vector_store %arg5[%c0_58, %c0_59], %210 {strides = array<i32>} : memref<3x128xi32, #tpu.memory_space<vmem>>, vector<3x128xi32>,
    return
  }
  func.func @transform_0(%arg0: i32) -> i32 {
    %c0_i32 = arith.constant 0 : i32
    %c0_i32_0 = arith.constant 0 : i32
    return %c0_i32 : i32
  }
  func.func @transform_1(%arg0: i32) -> (i32, i32) {
    %c0_i32 = arith.constant 0 : i32
    %c0_i32_0 = arith.constant 0 : i32
    %c0_i32_1 = arith.constant 0 : i32
    return %c0_i32, %c0_i32_0 : i32, i32
  }
  func.func @transform_2(%arg0: i32) -> (i32, i32, i32) {
    %c0_i32 = arith.constant 0 : i32
    %c0_i32_0 = arith.constant 0 : i32
    %c0_i32_1 = arith.constant 0 : i32
    return %c0_i32, %c0_i32_0, %arg0 : i32, i32, i32
  }
  func.func @transform_3(%arg0: i32) -> (i32, i32) {
    %c0_i32 = arith.constant 0 : i32
    %c0_i32_0 = arith.constant 0 : i32
    return %c0_i32, %arg0 : i32, i32
  }
  func.func @transform_4(%arg0: i32) -> (i32, i32) {
    %c0_i32 = arith.constant 0 : i32
    %c0_i32_0 = arith.constant 0 : i32
    return %c0_i32, %arg0 : i32, i32
  }
}

</mosaic_0001>

<bundles_post_ra>
// kernel: my_module_forward.1
= control target key start
LH: loop header
LB: loop body
LE: loop exit
PB: predicated region body
PF: predicated region fallthrough
CT: control target
= control target key end

     0   :  { %10 = vsyncpa [#allocation3], 0  ;;  %s295_s18 = smov [#allocation2]   ;;  %s410_s0 = inlined_call_operand.vmem [shape: f32[20], index: 0, kind: input, shape index: {}]   ;;  %s411_s1 = inlined_call_operand.vmem [shape: f32[5,5], index: 1, kind: input, shape index: {}]   ;;  %s412_s2 = inlined_call_operand.vmem [shape: f32[4,5,128], index: 2, kind: input, shape index: {}]   ;;  %s413_s3 = inlined_call_operand.vmem [shape: f32[3,128], index: 3, kind: output, shape index: {0}]   ;;  %s414_s4 = inlined_call_operand.vmem [shape: s32[3,128], index: 4, kind: output, shape index: {1}]  }
   0x1   :  { %s16_s17 = sshll.u32 %s410_s0, 4  ;;  %s17_s17 = int_to_ptr.vmem [resolvable:$true] %s16_s17 }
   0x2   :  { %19 = dma.vmem_to_smem %s17_s17, 16, %s295_s18, [#allocation3]  }
   0x3   :  { %293 = dma.done.wait [#allocation3], 16  }
   0x4   :  { %294 = vsyncadd [#allocation3], 4294967280 }
   0x5   :  { %28 = sfence }
   0x6   :  { %v51_v0 = vld [vmem:[%s411_s1] sm:$0x1f]  ;;  %v296_v1 = vmov 0   ;;  %v297_v2 = vmov 2   ;;  %v298_v3 = vmov 4   ;;  %v299_v4 = vmov 1  }
   0x7   :  { %275 = vset.pattern.permute.xlu0 %v296_v1  ;;  %277 = vset.pattern.permute.xlu1 %v297_v2  ;;  %v300_v5 = vmov 3   ;;  %s36_s0 = sld [smem:[#allocation2]]  ;;  %v29_v6 = vld [vmem:[%s412_s2] sm:$0x1f]  ;;  %v247_v7 = vld [vmem:[%s412_s2 + $0x8] sm:$0x1f] }
   0x8   :  { %54 = vperm.xlu0 %275, %v51_v0   ;;  %97 = vperm.xlu1 %277, %v51_v0   ;;  %s250_s1 = sld [smem:[#allocation2 + $0x1]]  ;;  %v248_v20 = vld [vmem:[%s412_s2 + $0x10] sm:$0x1f]  ;;  %v249_v36 = vld [vmem:[%s412_s2 + $0x18] sm:$0x1f] }
   0x9   :  { %279 = vset.pattern.permute.xlu2 %v298_v3  ;;  %s334_s21 = sld [smem:[#allocation2 + $0x2]] }
   0xa   :  { %141 = vperm.xlu2 %279, %v51_v0   ;;  %s336_s22 = sld [smem:[#allocation2 + $0x3]] }
   0xb   :  { %s257_s23 = sld [smem:[#allocation2 + $0x8]] }
   0xc   :  { %s338_s24 = sld [smem:[#allocation2 + $0x9]] }
   0xd   :  { %s340_s25 = sld [smem:[#allocation2 + $0xa]]  ;;  %v37_v8 = vstv %s36_s0 }
   0xe   :  { %s342_s26 = sld [smem:[#allocation2 + $0x4]]  ;;  %v40_v9 = vstv %s250_s1  ;;  %v38_v11 = vmul.f32 %v37_v8, %v29_v6 }
   0xf   :  { %s344_s27 = sld [smem:[#allocation2 + $0x5]]  ;;  %v41_v12 = vmul.f32 %v247_v7, %v40_v9  ;;  %v44_v18 = vstv %s334_s21 }
  0x10   :  { %276 = vset.pattern.permute.xlu0 %v299_v4  ;;  %278 = vset.pattern.permute.xlu1 %v300_v5  ;;  %s346_s28 = sld [smem:[#allocation2 + $0xc]]  ;;  %v45_v32 = vmul.f32 %v248_v20, %v44_v18  ;;  %v48_v33 = vstv %s336_s22 }
  0x11   :  { %75 = vperm.xlu0 %276, %v51_v0   ;;  %119 = vperm.xlu1 %278, %v51_v0   ;;  %s348_s29 = sld [smem:[#allocation2 + $0xd]]  ;;  %v82_v10 = vstv %s257_s23  ;;  %v42_v29 = vadd.f32 %v41_v12, %v38_v11  ;;  %v49_v49 = vmul.f32 %v249_v36, %v48_v33 }
  0x12   :  { %s350_s30 = sld [smem:[#allocation2 + $0x10]]  ;;  %v85_v13 = vstv %s338_s24  ;;  %v83_v19 = vmul.f32 %v82_v10, %v29_v6 }
  0x13   :  { %s352_s5 = sld [smem:[#allocation2 + $0x11]]  ;;  %v89_v21 = vstv %s340_s25  ;;  %v86_v22 = vmul.f32 %v247_v7, %v85_v13  ;;  %v46_v48 = vadd.f32 %v45_v32, %v42_v29 }
  0x14   :  { %s354_s6 = sld [smem:[#allocation2 + $0x6]]  ;;  %v60_v14 = vstv %s342_s26  ;;  %v90_v39 = vmul.f32 %v248_v20, %v89_v21 }
  0x15   :  { %s362_s11 = sld [smem:[#allocation2 + $0xe]]  ;;  %v63_v15 = vstv %s344_s27  ;;  %v61_v25 = vmul.f32 %v60_v14, %v29_v6  ;;  %v87_v38 = vadd.f32 %v86_v22, %v83_v19  ;;  %v50_v60 = vadd.f32 %v49_v49, %v46_v48 }
  0x16   :  { %s364_s12 = sld [smem:[#allocation2 + $0xb]]  ;;  %v104_v16 = vstv %s346_s28  ;;  %v64_v26 = vmul.f32 %v247_v7, %v63_v15 }
  0x17   :  { %s366_s13 = sld [smem:[#allocation2 + $0x12]]  ;;  %v107_v17 = vstv %s348_s29  ;;  %v105_v27 = vmul.f32 %v104_v16, %v29_v6  ;;  %v91_v53 = vadd.f32 %v90_v39, %v87_v38 }
  0x18   :  { %s369_s14 = sld [smem:[#allocation2 + $0x7]]  ;;  %v126_v23 = vstv %s350_s30  ;;  %v108_v28 = vmul.f32 %v247_v7, %v107_v17  ;;  %v65_v41 = vadd.f32 %v64_v26, %v61_v25 }
  0x19   :  { %280 = vset.pattern.permute.xlu0 %v298_v3  ;;  %s375_s15 = sld [smem:[#allocation2 + $0xf]]  ;;  %v129_v24 = vstv %s352_s5  ;;  %v127_v34 = vmul.f32 %v126_v23, %v29_v6 }
  0x1a   :  { %s384_s18 = sld [smem:[#allocation2 + $0x13]]  ;;  %v67_v30 = vstv %s354_s6  ;;  %v130_v35 = vmul.f32 %v247_v7, %v129_v24  ;;  %v109_v43 = vadd.f32 %v108_v28, %v105_v27 }
  0x1b   :  { %v111_v31 = vstv %s362_s11  ;;  %v68_v42 = vmul.f32 %v248_v20, %v67_v30 }
  0x1c   :  { %v93_v37 = vstv %s364_s12  ;;  %v112_v44 = vmul.f32 %v248_v20, %v111_v31  ;;  %v131_v51 = vadd.f32 %v130_v35, %v127_v34 }
  0x1d   :  { %v133_v40 = vstv %s366_s13  ;;  %v94_v54 = vmul.f32 %v249_v36, %v93_v37  ;;  %v69_v56 = vadd.f32 %v68_v42, %v65_v41 }
  0x1e   :  { %v71_v45 = vstv %s369_s14  ;;  %v134_v52 = vmul.f32 %v248_v20, %v133_v40  ;;  %v113_v58 = vadd.f32 %v112_v44, %v109_v43 }
  0x1f   :  { %v115_v46 = vstv %s375_s15  ;;  %v72_v57 = vmul.f32 %v249_v36, %v71_v45  ;;  %v95_v63 = vadd.f32 %v94_v54, %v91_v53 }
  0x20   :  { %v137_v55 = vstv %s384_s18  ;;  %v116_v59 = vmul.f32 %v249_v36, %v115_v46  ;;  %v135_v61 = vadd.f32 %v134_v52, %v131_v51 }
  0x21   :  { %v138_v62 = vmul.f32 %v249_v36, %v137_v55  ;;  %v73_v0 = vadd.f32 %v72_v57, %v69_v56 }
  0x22   :  { %v117_v1 = vadd.f32 %v116_v59, %v113_v58 }
  0x23   :  { %v139_v5 = vadd.f32 %v138_v62, %v135_v61 }
  0x64   :  { %v142_v4 = vpop.permute.xlu2 %141 }
  0x65   :  { %v144_v13 = vadd.f32 %v142_v4, %v139_v5 }
  0x67   :  { %v145_v18 = vmax.f32 %v144_v13, 0.0 }
  0x7a   :  { %v55_v47 = vpop.permute.xlu0 %54  ;;  %v98_v50 = vpop.permute.xlu1 %97 }
  0x7b   :  { %v57_v2 = vadd.f32 %v55_v47, %v50_v60  ;;  %v100_v8 = vadd.f32 %v98_v50, %v95_v63 }
  0x7d   :  { %v58_v11 = vmax.f32 %v57_v2, 0.0  ;;  %v101_v14 = vmax.f32 %v100_v8, 0.0 }
  0x83   :  { %v76_v6 = vpop.permute.xlu0 %75  ;;  %v120_v7 = vpop.permute.xlu1 %119 }
  0x84   :  { %v78_v9 = vadd.f32 %v76_v6, %v73_v0  ;;  %v122_v10 = vadd.f32 %v120_v7, %v117_v1 }
  0x86   :  { %v79_v12 = vmax.f32 %v78_v9, 0.0  ;;  %v123_v16 = vmax.f32 %v122_v10, 0.0 }
  0x88   :  { %v80_v15 = vadd.f32 %v79_v12, %v58_v11 }
  0x8a   :  { %v102_v17 = vadd.f32 %v101_v14, %v80_v15 }
  0x8c   :  { %v124_v19 = vadd.f32 %v123_v16, %v102_v17 }
  0x8e   :  { %v146_v20 = vadd.f32 %v145_v18, %v124_v19 }
  0x90   :  { %v148_v21 = vrot.slane %v146_v20, 1  ;;  %v151_v23 = vrot.slane %v146_v20, 2  ;;  %v154_v25 = vrot.slane %v146_v20, 3  ;;  %v157_v27 = vrot.slane %v146_v20, 4 }
  0x92   :  { %v150_v22 = vmax.f32 %v146_v20, %v148_v21 }
  0x94   :  { %v153_v24 = vmax.f32 %v150_v22, %v151_v23 }
  0x96   :  { %v156_v26 = vmax.f32 %v153_v24, %v154_v25 }
  0x98   :  { %v159_v28 = vmax.f32 %v156_v26, %v157_v27 }
  0x9a   :  { %v161_v29 = vrot.slane %v159_v28, 5  ;;  %v165_v30 = vrot.slane %v159_v28, 6  ;;  %v170_v33 = vrot.slane %v159_v28, 7  ;;  %vm175_vm3 = vcmp.eq.f32.partialorder %v146_v20, %v159_v28 }
  0x9c   :  { %vm163_vm0 = vcmp.eq.f32.partialorder %v146_v20, %v161_v29  ;;  %vm167_vm1 = vcmp.eq.f32.partialorder %v146_v20, %v165_v30  ;;  %vm172_vm2 = vcmp.eq.f32.partialorder %v146_v20, %v170_v33 }
  0x9d   :  { %v164_v31 = vsel %vm163_vm0, 3, %v298_v3 }
  0x9e   :  { %v168_v32 = vrot.slane %v164_v31, 1 }
  0xa0   :  { %v169_v34 = vsel %vm167_vm1, 2, %v168_v32 }
  0xa1   :  { %v173_v35 = vrot.slane %v169_v34, 1 }
  0xa3   :  { %v174_v36 = vsel %vm172_vm2, 1, %v173_v35  ;;  %vm228_vm2 = vcmask 1040384  }
  0xa4   :  { %v176_v37 = vrot.slane %v174_v36, 1 }
  0xa6   :  { %v177_v38 = vsel %vm175_vm3, 0, %v176_v37  ;;  %vm230_vm3 = vcmask 1041408  }
  0xa7   :  { %vm178_vm4 = vcmp.eq.s32.totalorder %v177_v38, 0  ;;  %vm180_vm5 = vcmp.eq.s32.totalorder %v177_v38, 1  ;;  %vm182_vm6 = vcmp.eq.s32.totalorder %v177_v38, 2  ;;  %vm184_vm7 = vcmp.eq.s32.totalorder %v177_v38, 3 }
  0xa8   :  { %v179_v39 = vsel %vm178_vm4, -inf, %v146_v20  ;;  %v181_v40 = vsel %vm180_vm5, -inf, %v148_v21  ;;  %v183_v42 = vsel %vm182_vm6, -inf, %v151_v23  ;;  %vm186_vm8 = vcmp.eq.s32.totalorder %v177_v38, 4 }
  0xa9   :  { %v188_v41 = vmax.f32 %v179_v39, %v181_v40  ;;  %v185_v44 = vsel %vm184_vm7, -inf, %v154_v25  ;;  %v187_v46 = vsel %vm186_vm8, -inf, %v157_v27 }
  0xab   :  { %v189_v43 = vmax.f32 %v188_v41, %v183_v42 }
  0xad   :  { %v190_v45 = vmax.f32 %v189_v43, %v185_v44 }
  0xaf   :  { %v191_v47 = vmax.f32 %v190_v45, %v187_v46 }
  0xb1   :  { %vm192_vm9 = vcmp.eq.f32.partialorder %v185_v44, %v191_v47  ;;  %vm194_vm10 = vcmp.eq.f32.partialorder %v183_v42, %v191_v47  ;;  %vm196_vm11 = vcmp.eq.f32.partialorder %v181_v40, %v191_v47  ;;  %vm198_vm12 = vcmp.eq.f32.partialorder %v179_v39, %v191_v47 }
  0xb2   :  { %v193_v48 = vsel %vm192_vm9, 3, %v298_v3  ;;  %v223_v61 = vrot.slane %v191_v47, 7 }
  0xb3   :  { %v195_v49 = vsel %vm194_vm10, 2, %v193_v48 }
  0xb4   :  { %v197_v50 = vsel %vm196_vm11, 1, %v195_v49  ;;  %v229_v1 = vsel %vm228_vm2, %v159_v28, %v223_v61 }
  0xb5   :  { %v199_v51 = vsel %vm198_vm12, 0, %v197_v50 }
  0xb6   :  { %vm200_vm13 = vcmp.eq.s32.totalorder %v199_v51, 0  ;;  %vm202_vm14 = vcmp.eq.s32.totalorder %v199_v51, 1  ;;  %vm204_vm15 = vcmp.eq.s32.totalorder %v199_v51, 2  ;;  %vm206_vm0 = vcmp.eq.s32.totalorder %v199_v51, 3 }
  0xb7   :  { %v201_v52 = vsel %vm200_vm13, -inf, %v179_v39  ;;  %v203_v53 = vsel %vm202_vm14, -inf, %v181_v40  ;;  %v205_v55 = vsel %vm204_vm15, -inf, %v183_v42  ;;  %vm208_vm1 = vcmp.eq.s32.totalorder %v199_v51, 4 }
  0xb8   :  { %v210_v54 = vmax.f32 %v201_v52, %v203_v53  ;;  %v207_v57 = vsel %vm206_vm0, -inf, %v185_v44  ;;  %v209_v59 = vsel %vm208_vm1, -inf, %v187_v46  ;;  %v233_v2 = vrot.slane %v199_v51, 7 }
  0xba   :  { %v211_v56 = vmax.f32 %v210_v54, %v205_v55  ;;  %v235_v8 = vsel %vm228_vm2, %v177_v38, %v233_v2 }
  0xbc   :  { %v212_v58 = vmax.f32 %v211_v56, %v207_v57 }
  0xbe   :  { %v213_v60 = vmax.f32 %v212_v58, %v209_v59 }
  0xc0   :  { %vm214_vm4 = vcmp.eq.f32.partialorder %v207_v57, %v213_v60  ;;  %vm216_vm5 = vcmp.eq.f32.partialorder %v205_v55, %v213_v60  ;;  %v226_v63 = vrot.slane %v213_v60, 6  ;;  %vm218_vm6 = vcmp.eq.f32.partialorder %v203_v53, %v213_v60 }
  0xc1   :  { %v215_v62 = vsel %vm214_vm4, 3, %v298_v3  ;;  %vm220_vm7 = vcmp.eq.f32.partialorder %v201_v52, %v213_v60 }
  0xc2   :  { %v217_v0 = vsel %vm216_vm5, 2, %v215_v62  ;;  %v231_v5 = vsel %vm230_vm3, %v229_v1, %v226_v63 }
  0xc3   :  { %v219_v4 = vsel %vm218_vm6, 1, %v217_v0  ;;  %232 = vst [vmem:[%s413_s3] sm:$0x7] %v231_v5 }
  0xc4   :  { %v221_v6 = vsel %vm220_vm7, 0, %v219_v4 }
  0xc5   :  { %v234_v7 = vrot.slane %v221_v6, 6 }
  0xc7   :  { %v236_v3 = vsel %vm230_vm3, %v235_v8, %v234_v7 }
  0xc8   :  { %237 = vst [vmem:[%s414_s4] sm:$0x7] %v236_v3 }
  0xc9   :  { %246 = vsyncpa [#allocation3], 1 }

</bundles_post_ra>
